<compile_context>
chip_gen: v6e
topology: v6e:2x2x1
jax: 0.10.0
libtpu: 0.0.40
codegen_flags: <defaults>
</compile_context>

<pallas_src>
import math

import jax
import jax.numpy as jnp
from jax.experimental import pallas as pl
from jax.experimental.pallas import tpu as pltpu


def _round_up(x, m):
    return -(-x // m) * m


# ---------------------------------------------------------------------------
# Generation-aware VMEM budget / scoped limit
# ---------------------------------------------------------------------------

_VMEM_CACHE = None


def _vmem_limits():
    """(working-set budget, vmem_limit_bytes) sized from the chip's VMEM."""
    global _VMEM_CACHE
    if _VMEM_CACHE is None:
        cap = 64 * 1024 * 1024                       # conservative fallback
        try:
            info = pltpu.get_tpu_info()
            cap = int(getattr(info, "vmem_capacity_bytes", cap)) or cap
        except Exception:
            pass
        budget = max(cap // 2, 24 * 1024 * 1024)     # ~64 MiB v5e/v6e, ~32 MiB v7x
        limit = max(min((cap * 3) // 4, 100 * 1024 * 1024), 32 * 1024 * 1024)
        _VMEM_CACHE = (budget, limit)
    return _VMEM_CACHE


def _pad_cout(c_out):
    # 256-lane multiple for the 2x256x256 MXU on v6e/v7x; 128 keeps output-write
    # inflation small when C_out itself is <= 128 (and is ideal on v5e).
    return _round_up(c_out, 256) if c_out > 128 else _round_up(c_out, 128)


# ---------------------------------------------------------------------------
# Kernels
# ---------------------------------------------------------------------------

def _fused_pool_conv_kernel(x_ref, w_ref, b_ref, o_ref):
    # x_ref: (4, tile_m, C_in) — the four 2x2 pool taps, tap-major.
    # Tap reduction on the VPU (3 full-tile adds); the 0.25 pool scale is
    # pre-folded into w, so a single MXU dot + f32 bias add finishes the layer.
    x = (x_ref[0] + x_ref[1]) + (x_ref[2] + x_ref[3])
    acc = jnp.dot(x, w_ref[...], preferred_element_type=jnp.float32)
    o_ref[...] = (acc + b_ref[...]).astype(o_ref.dtype)


def _global_avgpool_kernel(x_ref, o_ref):
    # x_ref: (tile_r, H*W).  Mean over the flattened spatial (lane) axis.
    x = x_ref[...].astype(jnp.float32)
    o_ref[...] = jnp.mean(x, axis=-1, keepdims=True).astype(o_ref.dtype)


# ---------------------------------------------------------------------------
# Tile selection (largest tile that fits the VMEM budget)
# ---------------------------------------------------------------------------

def _pick_tile_m(M, c_in, c_out_p, in_bytes, out_bytes, budget):
    # Weight + bias have constant index_maps -> fetched once, counted once.
    resident = c_in * c_out_p * in_bytes + c_out_p * 4
    for t in (1024, 512, 256, 128, 64, 32, 16, 8):
        if t > M:
            continue
        need = (resident
                + 2 * 4 * t * c_in * in_bytes    # double-buffered input taps
                + 2 * t * c_out_p * out_bytes)   # double-buffered output tile
        if need <= budget:
            return t
    return M if M < 8 else 8


def _pick_tile_r(R, HW, itemsize, budget):
    hw_pad = _round_up(HW, 128)
    for t in (4096, 2048, 1024, 512, 256, 128, 64, 32, 16, 8):
        if t > R:
            continue
        if 2 * t * hw_pad * itemsize <= budget:  # double-buffered input block
            return t
    return R if R < 8 else 8


# ---------------------------------------------------------------------------
# Weight prep (hoisted out of the per-call path)
# ---------------------------------------------------------------------------

def prepare_conv_weight(w, b, compute_dtype):
    """Fold the 0.25 pool scale, pad C_out to a lane-dense width, cast."""
    c_in, c_out = w.shape
    c_out_p = _pad_cout(c_out)
    w_scaled = (w * jnp.asarray(0.25, w.dtype)).astype(compute_dtype)
    w_p = jnp.zeros((c_in, c_out_p), compute_dtype).at[:, :c_out].set(w_scaled)
    b_p = jnp.zeros((1, c_out_p), jnp.float32).at[0, :c_out].set(
        b.astype(jnp.float32))
    return w_p, b_p


# ---------------------------------------------------------------------------
# Wrappers (NCHW in / NCHW out, matching PyTorch)
# ---------------------------------------------------------------------------

def transition_internal(x, w_p, b_p, c_out, *, compute_dtype=jnp.bfloat16):
    """Conv2d(C_in -> C_out, k=1) followed by AvgPool2d(2)."""
    N, C_in, H, W = x.shape
    Ho, Wo = H // 2, W // 2              # AvgPool2d(2) floors odd spatial dims
    M = N * Ho * Wo
    C_out_p = w_p.shape[1]

    # Single combined layout change NCHW -> (tap, M, C_in); the compute-dtype
    # cast is fused into the same XLA transpose so the materialized activation
    # stream is written at half width when compute_dtype is bf16.
    xc = x[:, :, :2 * Ho, :2 * Wo].astype(compute_dtype)
    xm = jnp.transpose(xc.reshape(N, C_in, Ho, 2, Wo, 2),
                       (3, 5, 0, 2, 4, 1)).reshape(4, M, C_in)

    budget, limit = _vmem_limits()
    in_bytes = jnp.dtype(compute_dtype).itemsize
    out_bytes = jnp.dtype(x.dtype).itemsize
    tile_m = _pick_tile_m(M, C_in, C_out_p, in_bytes, out_bytes, budget)

    # TODO(synk): if profiling shows exposed DMA on the xm stream, add
    # pipeline_mode=pl.Buffered(3) to the first in_spec instead of shrinking
    # the tile (only once VMEM headroom exists; skip on v7x if near 64 MiB).
    out = pl.pallas_call(
        _fused_pool_conv_kernel,
        out_shape=jax.ShapeDtypeStruct((M, C_out_p), x.dtype),
        grid_spec=pltpu.PrefetchScalarGridSpec(
            num_scalar_prefetch=0,
            grid=(pl.cdiv(M, tile_m),),
            in_specs=[pl.BlockSpec((4, tile_m, C_in), lambda i: (0, i, 0)),
                      pl.BlockSpec((C_in, C_out_p), lambda i: (0, 0)),
                      pl.BlockSpec((1, C_out_p), lambda i: (0, 0))],
            out_specs=pl.BlockSpec((tile_m, C_out_p), lambda i: (i, 0)),
        ),
        compiler_params=pltpu.CompilerParams(
            dimension_semantics=("parallel",),
            vmem_limit_bytes=limit),
    )(xm, w_p, b_p)

    out = out[:, :c_out].reshape(N, Ho, Wo, c_out)
    return jnp.transpose(out, (0, 3, 1, 2))          # -> NCHW (N, C_out, Ho, Wo)


def transition_last(x):
    """AdaptiveAvgPool2d(1). NCHW in / (N, C, 1, 1) out. No transposes."""
    N, C, H, W = x.shape
    HW = H * W
    R = N * C
    x2 = x.reshape(R, HW)                            # free (contiguous) reshape
    budget, limit = _vmem_limits()
    tile_r = _pick_tile_r(R, HW, jnp.dtype(x.dtype).itemsize, budget)
    out = pl.pallas_call(
        _global_avgpool_kernel,
        out_shape=jax.ShapeDtypeStruct((R, 1), x.dtype),
        grid_spec=pltpu.PrefetchScalarGridSpec(
            num_scalar_prefetch=0,
            grid=(pl.cdiv(R, tile_r),),
            in_specs=[pl.BlockSpec((tile_r, HW), lambda i: (i, 0))],
            out_specs=pl.BlockSpec((tile_r, 1), lambda i: (i, 0)),
        ),
        compiler_params=pltpu.CompilerParams(
            dimension_semantics=("parallel",),
            vmem_limit_bytes=limit),
    )(x2)
    return out.reshape(N, C, 1, 1)


# ---------------------------------------------------------------------------
# Module port
# ---------------------------------------------------------------------------

class TransitionLayer:
    """JAX/Pallas port of models/DenseNet.py::TransitionLayer."""

    def __init__(self, in_channels, compact, l, m_block, c_block, key,
                 compute_dtype=jnp.bfloat16):
        self.in_channels = in_channels
        self.compact = compact
        self.l = l
        self.m_block = m_block
        self.c_block = c_block
        self.compute_dtype = compute_dtype
        self.out_channels = int(math.floor(in_channels * compact))
        # nn.Conv2d default init: U(-k, k), k = 1/sqrt(fan_in); 1x1 conv stored
        # as a (C_in, C_out) matmul weight.
        k = 1.0 / math.sqrt(in_channels * 1 * 1)
        kw, kb = jax.random.split(key)
        self.w = jax.random.uniform(kw, (in_channels, self.out_channels),
                                    jnp.float32, -k, k)
        self.b = jax.random.uniform(kb, (self.out_channels,), jnp.float32, -k, k)
        # Hoisted one-time weight prep (0.25 pool fold, lane pad, dtype cast).
        self.w_p, self.b_p = prepare_conv_weight(self.w, self.b, compute_dtype)

    def __call__(self, x):
        if self.m_block == self.c_block:
            return transition_last(x)
        return transition_internal(x, self.w_p, self.b_p, self.out_channels,
                                   compute_dtype=self.compute_dtype)


def _reference(layer, x):
    """Plain-JAX reference mirroring the PyTorch forward (conv -> avgpool)."""
    if layer.m_block == layer.c_block:
        return jnp.mean(x, axis=(2, 3), keepdims=True)
    y = jnp.einsum('nchw,co->nohw', x, layer.w) + layer.b[None, :, None, None]
    N, Co, H, W = y.shape
    Ho, Wo = H // 2, W // 2
    y = y[:, :, :2 * Ho, :2 * Wo]
    return y.reshape(N, Co, Ho, 2, Wo, 2).mean(axis=(3, 5))


if __name__ == "__main__":
    key = jax.random.PRNGKey(0)
    kx, kx2, kp = jax.random.split(key, 3)
    x = jax.random.normal(kx, (2, 4, 16, 16), jnp.float32)   # NCHW like PyTorch

    # Internal path, default bf16 compute: Conv1x1 + AvgPool2d(2).
    layer_bf16 = TransitionLayer(in_channels=4, compact=0.5, l=1,
                                 m_block=0, c_block=2, key=kp)
    y_bf16 = jax.block_until_ready(layer_bf16(x))
    assert y_bf16.shape == (2, 2, 8, 8), y_bf16.shape
    assert jnp.allclose(y_bf16, _reference(layer_bf16, x), rtol=1e-2, atol=1e-2)

    # Same layer with f32 compute: tight-tolerance correctness check.
    layer_f32 = TransitionLayer(in_channels=4, compact=0.5, l=1,
                                m_block=0, c_block=2, key=kp,
                                compute_dtype=jnp.float32)
    y_f32 = jax.block_until_ready(layer_f32(x))
    assert y_f32.shape == (2, 2, 8, 8), y_f32.shape
    assert jnp.allclose(y_f32, _reference(layer_f32, x), rtol=1e-4, atol=1e-5)

    # Odd spatial dims (AvgPool2d(2) floors) + non-divisible M -> partial tile.
    x_odd = jax.random.normal(kx2, (2, 4, 15, 13), jnp.float32)
    y_odd = jax.block_until_ready(layer_f32(x_odd))
    assert y_odd.shape == (2, 2, 7, 6), y_odd.shape
    assert jnp.allclose(y_odd, _reference(layer_f32, x_odd), rtol=1e-4, atol=1e-5)

    # Last-layer path: m_block == c_block -> AdaptiveAvgPool2d(1).
    layer_last = TransitionLayer(in_channels=4, compact=0.5, l=1,
                                 m_block=2, c_block=2, key=kp)
    y_last = jax.block_until_ready(layer_last(x))
    assert y_last.shape == (2, 4, 1, 1), y_last.shape
    assert jnp.allclose(y_last, _reference(layer_last, x), rtol=1e-4, atol=1e-5)

    print("KERNEL_OK")
</pallas_src>

<mosaic_0001>
module attributes {stable_mosaic.version = 11 : i64} {
  func.func @_fused_pool_conv_kernel(%arg0: i32, %arg1: memref<4x128x4xbf16, #tpu.memory_space<vmem>>, %arg2: memref<4x128xbf16, #tpu.memory_space<vmem>>, %arg3: memref<1x128xf32, #tpu.memory_space<vmem>>, %arg4: memref<128x128xf32, #tpu.memory_space<vmem>>) attributes {dimension_semantics = [#tpu.dimension_semantics<parallel>], iteration_bounds = array<i64: 1>, scalar_prefetch = 0 : i64, scratch_operands = 0 : i64, tpu.core_type = #tpu.core_type<tc>, window_params = [{transform_indices = @transform_0, window_bounds = array<i64: 4, 128, 4>}, {pipeline_mode = #tpu.pipeline_mode<synchronous>, transform_indices = @transform_1, window_bounds = array<i64: 4, 128>}, {pipeline_mode = #tpu.pipeline_mode<synchronous>, transform_indices = @transform_2, window_bounds = array<i64: 1, 128>}, {transform_indices = @transform_3, window_bounds = array<i64: 128, 128>}]} {
    %c0 = arith.constant 0 : index
    %c0_0 = arith.constant 0 : index
    %c0_1 = arith.constant 0 : index
    %0 = vector.load %arg1[%c0, %c0_0, %c0_1] : memref<4x128x4xbf16, #tpu.memory_space<vmem>>, vector<1x128x4xbf16>
    %1 = vector.shape_cast %0 : vector<1x128x4xbf16> to vector<128x4xbf16>
    %c1 = arith.constant 1 : index
    %c0_2 = arith.constant 0 : index
    %c0_3 = arith.constant 0 : index
    %2 = vector.load %arg1[%c1, %c0_2, %c0_3] : memref<4x128x4xbf16, #tpu.memory_space<vmem>>, vector<1x128x4xbf16>
    %3 = vector.shape_cast %2 : vector<1x128x4xbf16> to vector<128x4xbf16>
    %4 = arith.addf %1, %3 : vector<128x4xbf16>
    %c2 = arith.constant 2 : index
    %c0_4 = arith.constant 0 : index
    %c0_5 = arith.constant 0 : index
    %5 = vector.load %arg1[%c2, %c0_4, %c0_5] : memref<4x128x4xbf16, #tpu.memory_space<vmem>>, vector<1x128x4xbf16>
    %6 = vector.shape_cast %5 : vector<1x128x4xbf16> to vector<128x4xbf16>
    %c3 = arith.constant 3 : index
    %c0_6 = arith.constant 0 : index
    %c0_7 = arith.constant 0 : index
    %7 = vector.load %arg1[%c3, %c0_6, %c0_7] : memref<4x128x4xbf16, #tpu.memory_space<vmem>>, vector<1x128x4xbf16>
    %8 = vector.shape_cast %7 : vector<1x128x4xbf16> to vector<128x4xbf16>
    %9 = arith.addf %6, %8 : vector<128x4xbf16>
    %10 = arith.addf %4, %9 : vector<128x4xbf16>
    %c0_8 = arith.constant 0 : index
    %c0_9 = arith.constant 0 : index
    %11 = vector.load %arg2[%c0_8, %c0_9] : memref<4x128xbf16, #tpu.memory_space<vmem>>, vector<4x128xbf16>
    %cst = arith.constant dense<0.000000e+00> : vector<128x128xf32>
    %12 = tpu.matmul %10, %11, %cst {dimension_numbers = #tpu.dot_dimension_numbers<[1], [0], [0], [1], [0, 0, 1, 1], [], []>} : vector<128x4xbf16>, vector<4x128xbf16>, vector<128x128xf32> -> vector<128x128xf32>
    %c0_10 = arith.constant 0 : index
    %c0_11 = arith.constant 0 : index
    %13 = vector.load %arg3[%c0_10, %c0_11] : memref<1x128xf32, #tpu.memory_space<vmem>>, vector<1x128xf32>
    %14 = vector.broadcast %13 : vector<1x128xf32> to vector<128x128xf32>
    %15 = arith.addf %12, %14 : vector<128x128xf32>
    %c0_12 = arith.constant 0 : index
    %c0_13 = arith.constant 0 : index
    %16 = vector.load %arg4[%c0_12, %c0_13] : memref<128x128xf32, #tpu.memory_space<vmem>>, vector<128x128xf32>
    tpu.vector_store %arg4[%c0_12, %c0_13], %15 {strides = array<i32>} : memref<128x128xf32, #tpu.memory_space<vmem>>, vector<128x128xf32>,
    return
  }
  func.func @transform_0(%arg0: i32) -> (i32, i32, i32) {
    %c0_i32 = arith.constant 0 : i32
    %c0_i32_0 = arith.constant 0 : i32
    %c0_i32_1 = arith.constant 0 : i32
    return %c0_i32, %arg0, %c0_i32_0 : i32, i32, i32
  }
  func.func @transform_1(%arg0: i32) -> (i32, i32) {
    %c0_i32 = arith.constant 0 : i32
    %c0_i32_0 = arith.constant 0 : i32
    %c0_i32_1 = arith.constant 0 : i32
    return %c0_i32, %c0_i32_0 : i32, i32
  }
  func.func @transform_2(%arg0: i32) -> (i32, i32) {
    %c0_i32 = arith.constant 0 : i32
    %c0_i32_0 = arith.constant 0 : i32
    %c0_i32_1 = arith.constant 0 : i32
    return %c0_i32, %c0_i32_0 : i32, i32
  }
  func.func @transform_3(%arg0: i32) -> (i32, i32) {
    %c0_i32 = arith.constant 0 : i32
    %c0_i32_0 = arith.constant 0 : i32
    return %arg0, %c0_i32 : i32, i32
  }
}

</mosaic_0001>

<bundles_post_ra>
// kernel: tpu_custom_call.1
= control target key start
LH: loop header
LB: loop body
LE: loop exit
PB: predicated region body
PF: predicated region fallthrough
CT: control target
= control target key end

     0   :  { %vm204_vm0 = vcmask 1041408   ;;  %vm179_vm1 = vcmask 31744   ;;  %s690_s0 = inlined_call_operand.vmem [shape: bf16[4,128,4], index: 0, kind: input, shape index: {}]   ;;  %s691_s1 = inlined_call_operand.vmem [shape: bf16[4,128], index: 1, kind: input, shape index: {}]   ;;  %s692_s2 = inlined_call_operand.vmem [shape: f32[1,128], index: 2, kind: input, shape index: {}]   ;;  %s693_s3 = inlined_call_operand.hbm [shape: f32[128,128], index: 3, kind: output, shape index: {}]  }
   0x1   :  { %v131_v0 = vld [vmem:[%s691_s1] sm:$0x3]  ;;  %v17_v3 = vld [vmem:[%s690_s0 + $0x4] sm:$0xf]  ;;  %v18_v27 = vld [vmem:[%s690_s0 + $0x8] sm:$0xf] }
   0x2   :  { %v16_v1 = vld [vmem:[%s690_s0] sm:$0xf]  ;;  %431 = vmatprep.subr.msk.bf16.mxu0 %vm204_vm0, %v131_v0  ;;  %432 = vmatprep.subr.msk.bf16.mxu1 %vm204_vm0, %v131_v0  ;;  %v206_v2 = vsel %vm204_vm0, %v131_v0, 0  ;;  %v338_v5 = vld [vmem:[%s690_s0 + $0x44] sm:$0xf] }
   0x3   :  { %v337_v4 = vld [vmem:[%s690_s0 + $0x40] sm:$0xf]  ;;  %412 = vmatpush3.bf16.msra.mxu0 %v206_v2  ;;  %430 = vmatpush3.bf16.msra.mxu1 %v206_v2  ;;  %v354_v8 = vld [vmem:[%s690_s0 + $0x84] sm:$0xf]  ;;  %v50_v9 = vadd.bf16 %v338_v5, %v17_v3  ;;  %v19_v28 = vld [vmem:[%s690_s0 + $0xc] sm:$0xf] }
   0x4   :  { %v49_v6 = vadd.bf16 %v337_v4, %v16_v1  ;;  %v353_v7 = vld [vmem:[%s690_s0 + $0x80] sm:$0xf]  ;;  %v370_v11 = vld [vmem:[%s690_s0 + $0xc4] sm:$0xf]  ;;  %v339_v30 = vld [vmem:[%s690_s0 + $0x48] sm:$0xf] }
   0x5   :  { %v369_v10 = vld [vmem:[%s690_s0 + $0xc0] sm:$0xf]  ;;  %v100_v14 = vadd.bf16 %v370_v11, %v354_v8  ;;  %v25_v15 = vld [vmem:[%s690_s0 + $0x24] sm:$0xf]  ;;  %v340_v31 = vld [vmem:[%s690_s0 + $0x4c] sm:$0xf]  ;;  %v51_v35 = vadd.bf16 %v339_v30, %v18_v27 }
   0x6   :  { %v24_v12 = vld [vmem:[%s690_s0 + $0x20] sm:$0xf]  ;;  %v99_v13 = vadd.bf16 %v369_v10, %v353_v7  ;;  %v346_v17 = vld [vmem:[%s690_s0 + $0x64] sm:$0xf]  ;;  %v355_v32 = vld [vmem:[%s690_s0 + $0x88] sm:$0xf]  ;;  %v52_v36 = vadd.bf16 %v340_v31, %v19_v28 }
   0x7   :  { %v345_v16 = vld [vmem:[%s690_s0 + $0x60] sm:$0xf]  ;;  %v58_v19 = vadd.bf16 %v346_v17, %v25_v15  ;;  %v362_v21 = vld [vmem:[%s690_s0 + $0xa4] sm:$0xf]  ;;  %v116_v24 = vadd.bf16 %v100_v14, %v50_v9  ;;  %v356_v37 = vld [vmem:[%s690_s0 + $0x8c] sm:$0xf] }
   0x8   :  { %v57_v18 = vadd.bf16 %v345_v16, %v24_v12  ;;  %v361_v20 = vld [vmem:[%s690_s0 + $0xa0] sm:$0xf]  ;;  %v115_v23 = vadd.bf16 %v99_v13, %v49_v6  ;;  %v378_v25 = vld [vmem:[%s690_s0 + $0xe4] sm:$0xf]  ;;  %v371_v38 = vld [vmem:[%s690_s0 + $0xc8] sm:$0xf] }
   0x9   :  { %v377_v22 = vld [vmem:[%s690_s0 + $0xe0] sm:$0xf]  ;;  %v108_v29 = vadd.bf16 %v378_v25, %v362_v21  ;;  %v372_v39 = vld [vmem:[%s690_s0 + $0xcc] sm:$0xf]  ;;  %v101_v41 = vadd.bf16 %v371_v38, %v355_v32  ;;  %v26_v43 = vld [vmem:[%s690_s0 + $0x28] sm:$0xf] }
   0xa   :  { %v107_v26 = vadd.bf16 %v377_v22, %v361_v20  ;;  %v386_v33 = vcombine.low %v115_v23, %v116_v24  ;;  %v102_v42 = vadd.bf16 %v372_v39, %v356_v37  ;;  %v27_v44 = vld [vmem:[%s690_s0 + $0x2c] sm:$0xf]  ;;  %v347_v45 = vld [vmem:[%s690_s0 + $0x68] sm:$0xf]  ;;  %v20_v56 = vld [vmem:[%s690_s0 + $0x10] sm:$0xf] }
   0xb   :  { %v124_v40 = vadd.bf16 %v108_v29, %v58_v19  ;;  %v348_v46 = vld [vmem:[%s690_s0 + $0x6c] sm:$0xf]  ;;  %v59_v47 = vadd.bf16 %v347_v45, %v26_v43  ;;  %v363_v48 = vld [vmem:[%s690_s0 + $0xa8] sm:$0xf]  ;;  %v117_v51 = vadd.bf16 %v101_v41, %v51_v35  ;;  %v21_v59 = vld [vmem:[%s690_s0 + $0x14] sm:$0xf] }
   0xc   :  { %v123_v34 = vadd.bf16 %v107_v26, %v57_v18  ;;  %413 = vmatprep.mubr.msk.bf16.mxu0 %vm179_vm1, %v386_v33  ;;  %v364_v49 = vld [vmem:[%s690_s0 + $0xac] sm:$0xf]  ;;  %v118_v52 = vadd.bf16 %v102_v42, %v52_v36  ;;  %v60_v53 = vadd.bf16 %v348_v46, %v27_v44  ;;  %v379_v54 = vld [vmem:[%s690_s0 + $0xe8] sm:$0xf]  ;;  %v341_v60 = vld [vmem:[%s690_s0 + $0x50] sm:$0xf] }
   0xd   :  { %v380_v55 = vld [vmem:[%s690_s0 + $0xec] sm:$0xf]  ;;  %v109_v57 = vadd.bf16 %v379_v54, %v363_v48  ;;  %v342_v61 = vld [vmem:[%s690_s0 + $0x54] sm:$0xf]  ;;  %v53_v63 = vadd.bf16 %v341_v60, %v20_v56  ;;  %v357_v1 = vld [vmem:[%s690_s0 + $0x90] sm:$0xf] }
   0xe   :  { %v390_v50 = vcombine.low %v123_v34, %v124_v40  ;;  %v110_v58 = vadd.bf16 %v380_v55, %v364_v49  ;;  %v387_v62 = vcombine.low %v117_v51, %v118_v52  ;;  %v54_v0 = vadd.bf16 %v342_v61, %v21_v59  ;;  %v358_v2 = vld [vmem:[%s690_s0 + $0x94] sm:$0xf]  ;;  %v373_v3 = vld [vmem:[%s690_s0 + $0xd0] sm:$0xf]  ;;  %v22_v24 = vld [vmem:[%s690_s0 + $0x18] sm:$0xf] }
   0xf   :  { %v125_v4 = vadd.bf16 %v109_v57, %v59_v47  ;;  %v374_v6 = vld [vmem:[%s690_s0 + $0xd4] sm:$0xf]  ;;  %v103_v7 = vadd.bf16 %v373_v3, %v357_v1  ;;  %v28_v8 = vld [vmem:[%s690_s0 + $0x30] sm:$0xf]  ;;  %v23_v25 = vld [vmem:[%s690_s0 + $0x1c] sm:$0xf] }
  0x10   :  { %421 = vmatprep.mubr.msk.bf16.mxu1 %vm179_vm1, %v390_v50  ;;  %v126_v5 = vadd.bf16 %v110_v58, %v60_v53  ;;  %v29_v9 = vld [vmem:[%s690_s0 + $0x34] sm:$0xf]  ;;  %414 = vmatmul.mubr.msk.bf16.vlgmr.msra.gmra.mxu0 %vm179_vm1, %v387_v62  ;;  %v104_v10 = vadd.bf16 %v374_v6, %v358_v2  ;;  %v349_v11 = vld [vmem:[%s690_s0 + $0x70] sm:$0xf]  ;;  %v343_v26 = vld [vmem:[%s690_s0 + $0x58] sm:$0xf] }
  0x11   :  { %v350_v12 = vld [vmem:[%s690_s0 + $0x74] sm:$0xf]  ;;  %v365_v13 = vld [vmem:[%s690_s0 + $0xb0] sm:$0xf]  ;;  %v119_v15 = vadd.bf16 %v103_v7, %v53_v63  ;;  %v61_v16 = vadd.bf16 %v349_v11, %v28_v8  ;;  %v344_v27 = vld [vmem:[%s690_s0 + $0x5c] sm:$0xf]  ;;  %v55_v28 = vadd.bf16 %v343_v26, %v22_v24 }
  0x12   :  { %v391_v14 = vcombine.low %v125_v4, %v126_v5  ;;  %v62_v17 = vadd.bf16 %v350_v12, %v29_v9  ;;  %v366_v18 = vld [vmem:[%s690_s0 + $0xb4] sm:$0xf]  ;;  %v381_v19 = vld [vmem:[%s690_s0 + $0xf0] sm:$0xf]  ;;  %v120_v21 = vadd.bf16 %v104_v10, %v54_v0  ;;  %v359_v29 = vld [vmem:[%s690_s0 + $0x98] sm:$0xf]  ;;  %v56_v34 = vadd.bf16 %v344_v27, %v23_v25 }
  0x13   :  { %v382_v20 = vld [vmem:[%s690_s0 + $0xf4] sm:$0xf]  ;;  %v111_v22 = vadd.bf16 %v381_v19, %v365_v13  ;;  %v360_v30 = vld [vmem:[%s690_s0 + $0x9c] sm:$0xf]  ;;  %v375_v35 = vld [vmem:[%s690_s0 + $0xd8] sm:$0xf] }
  0x14   :  { %v112_v23 = vadd.bf16 %v382_v20, %v366_v18  ;;  %422 = vmatmul.mubr.msk.bf16.vlgmr.msra.gmra.mxu1 %vm179_vm1, %v391_v14  ;;  %v388_v31 = vcombine.low %v119_v15, %v120_v21  ;;  %v376_v36 = vld [vmem:[%s690_s0 + $0xdc] sm:$0xf]  ;;  %v30_v37 = vld [vmem:[%s690_s0 + $0x38] sm:$0xf]  ;;  %v105_v38 = vadd.bf16 %v375_v35, %v359_v29 }
  0x15   :  { %v127_v32 = vadd.bf16 %v111_v22, %v61_v16  ;;  %v106_v39 = vadd.bf16 %v376_v36, %v360_v30  ;;  %v31_v40 = vld [vmem:[%s690_s0 + $0x3c] sm:$0xf]  ;;  %v351_v41 = vld [vmem:[%s690_s0 + $0x78] sm:$0xf] }
  0x16   :  { %v128_v33 = vadd.bf16 %v112_v23, %v62_v17  ;;  %v352_v42 = vld [vmem:[%s690_s0 + $0x7c] sm:$0xf]  ;;  %417 = vmatprep.mubr.msk.bf16.mxu0 %vm179_vm1, %v388_v31  ;;  %v63_v44 = vadd.bf16 %v351_v41, %v30_v37  ;;  %v367_v46 = vld [vmem:[%s690_s0 + $0xb8] sm:$0xf]  ;;  %v121_v49 = vadd.bf16 %v105_v38, %v55_v28 }
  0x17   :  { %v64_v45 = vadd.bf16 %v352_v42, %v31_v40  ;;  %v368_v47 = vld [vmem:[%s690_s0 + $0xbc] sm:$0xf]  ;;  %v383_v48 = vld [vmem:[%s690_s0 + $0xf8] sm:$0xf]  ;;  %v122_v50 = vadd.bf16 %v106_v39, %v56_v34 }
  0x18   :  { %v392_v43 = vcombine.low %v127_v32, %v128_v33  ;;  %v384_v51 = vld [vmem:[%s690_s0 + $0xfc] sm:$0xf]  ;;  %v113_v52 = vadd.bf16 %v383_v48, %v367_v46 }
  0x19   :  { %8 = vsyncpa [#allocation3], 0  ;;  %v114_v53 = vadd.bf16 %v384_v51, %v368_v47  ;;  %v389_v54 = vcombine.low %v121_v49, %v122_v50  ;;  %v385_v58 = vld [vmem:[%s692_s2] ss:$0 sm:$0xff]  ;;  %s458_s0 = smov [#allocation2]  }
  0x1a   :  { %425 = vmatprep.mubr.msk.bf16.mxu1 %vm179_vm1, %v392_v43  ;;  %v129_v55 = vadd.bf16 %v113_v52, %v63_v44  ;;  %s326_s2 = sshll.u32 %s458_s0, 4  ;;  %s327_s2 = int_to_ptr.vmem [resolvable:$true] %s326_s2 }
  0x1b   :  { %v130_v56 = vadd.bf16 %v114_v53, %v64_v45  ;;  %418 = vmatmul.mubr.msk.bf16.gmra.mxu0 %vm179_vm1, %v389_v54  ;;  %s436_s4 = scalar_lea.vmem %s327_s2, 2048  ;;  %p441_p1 = scmp.lt.s32.totalorder %s327_s2, %s327_s2 }
  0x1c   :  { %p437_p0 = scmp.ne.s32.totalorder %s327_s2, %s436_s4  ;;  %p442_p2 = scmp.lt.s32.totalorder %s436_s4, %s436_s4 }
  0x1d   :  { %v393_v57 = vcombine.low %v129_v55, %v130_v56 }
  0x1e   :  { %p443_p3 = por %p442_p2, %p441_p1 }
  0x1f   :  { %426 = vmatmul.mubr.msk.bf16.gmra.mxu1 %vm179_vm1, %v393_v57 }
  0x20   :  { %p444_p4 = pnand %p443_p3, %p437_p0 }
  0xd0   :  { %v415_v59 = vpop.f32.mrf.mxu0 }
  0xd1   :  { %v251_v60 = vadd.f32 %v415_v59, %v385_v58 }
  0xd2   :  { %v242_v61 = vpop.f32.mrf.mxu0 }
  0xd3   :  { %307 = vst [vmem:[#allocation2 + $0x10] sm:$0xff] %v251_v60  ;;  %v243_v63 = vadd.f32 %v385_v58, %v242_v61 }
  0xd4   :  { %v423_v62 = vpop.f32.mrf.mxu1  ;;  %v416_v1 = vpop.f32.mrf.mxu0 }
  0xd5   :  { %v283_v0 = vadd.f32 %v423_v62, %v385_v58  ;;  %305 = vst [vmem:[#allocation2] sm:$0xff] %v243_v63  ;;  %v254_v3 = vadd.f32 %v416_v1, %v385_v58 }
  0xd6   :  { %v274_v2 = vpop.f32.mrf.mxu1  ;;  %v245_v5 = vpop.f32.mrf.mxu0 }
  0xd7   :  { %315 = vst [vmem:[#allocation2 + $0x50] sm:$0xff] %v283_v0  ;;  %v275_v4 = vadd.f32 %v385_v58, %v274_v2  ;;  %308 = vst [vmem:[#allocation2 + $0x18] sm:$0xff] %v254_v3  ;;  %v246_v7 = vadd.f32 %v385_v58, %v245_v5 }
  0xd8   :  { %v424_v6 = vpop.f32.mrf.mxu1 }
  0xd9   :  { %313 = vst [vmem:[#allocation2 + $0x40] sm:$0xff] %v275_v4  ;;  %v286_v8 = vadd.f32 %v424_v6, %v385_v58  ;;  %306 = vst [vmem:[#allocation2 + $0x8] sm:$0xff] %v246_v7 }
  0xda   :  { %v277_v9 = vpop.f32.mrf.mxu1 }
  0xdb   :  { %316 = vst [vmem:[#allocation2 + $0x58] sm:$0xff] %v286_v8  ;;  %v278_v10 = vadd.f32 %v385_v58, %v277_v9  ;;  %v419_v11 = vpop.f32.mrf.mxu0 }
  0xdc   :  { %v267_v12 = vadd.f32 %v419_v11, %v385_v58 }
  0xdd   :  { %314 = vst [vmem:[#allocation2 + $0x48] sm:$0xff] %v278_v10  ;;  %v258_v13 = vpop.f32.mrf.mxu0 }
  0xde   :  { %311 = vst [vmem:[#allocation2 + $0x30] sm:$0xff] %v267_v12  ;;  %v259_v15 = vadd.f32 %v385_v58, %v258_v13 }
  0xdf   :  { %v427_v14 = vpop.f32.mrf.mxu1  ;;  %v420_v17 = vpop.f32.mrf.mxu0 }
  0xe0   :  { %v299_v16 = vadd.f32 %v427_v14, %v385_v58  ;;  %309 = vst [vmem:[#allocation2 + $0x20] sm:$0xff] %v259_v15  ;;  %v270_v19 = vadd.f32 %v420_v17, %v385_v58 }
  0xe1   :  { %v290_v18 = vpop.f32.mrf.mxu1  ;;  %v261_v21 = vpop.f32.mrf.mxu0 }
  0xe2   :  { %319 = vst [vmem:[#allocation2 + $0x70] sm:$0xff] %v299_v16  ;;  %v291_v20 = vadd.f32 %v385_v58, %v290_v18  ;;  %312 = vst [vmem:[#allocation2 + $0x38] sm:$0xff] %v270_v19  ;;  %v262_v23 = vadd.f32 %v385_v58, %v261_v21 }
  0xe3   :  { %v428_v22 = vpop.f32.mrf.mxu1 }
  0xe4   :  { %317 = vst [vmem:[#allocation2 + $0x60] sm:$0xff] %v291_v20  ;;  %v302_v24 = vadd.f32 %v428_v22, %v385_v58  ;;  %310 = vst [vmem:[#allocation2 + $0x28] sm:$0xff] %v262_v23 }
  0xe5   :  { %v293_v25 = vpop.f32.mrf.mxu1 }
  0xe6   :  { %320 = vst [vmem:[#allocation2 + $0x78] sm:$0xff] %v302_v24  ;;  %v294_v26 = vadd.f32 %v385_v58, %v293_v25 }
  0xe8   :  { %318 = vst [vmem:[#allocation2 + $0x68] sm:$0xff] %v294_v26 }
  0xe9   :  { %447 = shalt.err (!%p444_p4)
}
  0xea   :  { %s459_s5 = smov 128   ;;  %s460_s6 = smov 8  }
  0xeb   :  { %332 = dma.vmem_to_hbm [thread:$0]  %s327_s2, 2048, %s693_s3, [#allocation3], %s459_s5, %s459_s5, %s460_s6  }
  0xec   :  { %456 = dma.done.wait [#allocation3], 2048  }
  0xed   :  { %457 = vsyncadd [#allocation3], 4294965248 }
  0xee   :  { %336 = vsyncpa [#allocation3], 1 }

</bundles_post_ra>
